<compile_context>
chip_gen: v6e
topology: v6e:2x2x1
jax: 0.10.0
libtpu: 0.0.40
codegen_flags: <defaults>
</compile_context>

<pallas_src>
import functools

import jax
import jax.numpy as jnp
from jax.experimental import pallas as pl
from jax.experimental.pallas import tpu as pltpu


# ---------------------------------------------------------------------------
# Pallas kernel: per-pixel cross entropy, pixels on lanes, classes on sublanes
# ---------------------------------------------------------------------------
def _ce_kernel(logits_ref, target_ref, loss_ref, psum_ref, *, hw, tile):
    """One tile of pixels.

    logits_ref: (C, T) input dtype   target_ref: (1, T) int32
    loss_ref:   (1, T) f32           psum_ref:   (1, 1) f32 (masked tile sum)
    """
    logits = logits_ref[...]                                      # (C, T)
    tgt = target_ref[...]                                         # (1, T)

    # max / compare / select are exact in the native dtype (halves VPU traffic
    # and VMEM temporaries for bf16 inputs); only the exp/log path is f32.
    m = jnp.max(logits, axis=0, keepdims=True)                    # (1, T)
    row = jax.lax.broadcasted_iota(jnp.int32, logits.shape, 0)    # (C, T)
    # Pick logits[target[p], p] with a one-hot select (no dynamic gather on TPU).
    # TODO(synk): no ignore_index handling (the reference module relies on all
    # targets being valid class ids).
    picked = jnp.sum(jnp.where(row == tgt, logits, jnp.zeros_like(logits)),
                     axis=0, keepdims=True)                       # (1, T)

    z = logits.astype(jnp.float32) - m.astype(jnp.float32)        # (C, T) f32
    lse = jnp.log(jnp.sum(jnp.exp(z), axis=0, keepdims=True))     # (1, T) f32

    # loss = -log_softmax(logits)[target] = lse + m - picked   (picked/m come
    # straight from the raw logits: one fewer (C, T)-sized f32 temporary).
    loss = lse + (m.astype(jnp.float32) - picked.astype(jnp.float32))
    loss_ref[...] = loss

    # Fused, lane-masked per-tile partial sum: the warm-phase mean then needs
    # no extra HBM pass over the raw losses.  The tail block's out-of-range
    # lanes hold garbage -> mask them here (Pallas already drops them from the
    # loss_ref writeback).
    lane = jax.lax.broadcasted_iota(jnp.int32, loss.shape, 1)     # (1, T)
    valid = (pl.program_id(1) * tile + lane) < hw
    psum_ref[...] = jnp.sum(jnp.where(valid, loss, 0.0), axis=1, keepdims=True)


# ---------------------------------------------------------------------------
# Tile / VMEM-budget selection
# ---------------------------------------------------------------------------
def _cdiv(a, b):
    return -(-a // b)


def _round_up(x, m):
    return ((x + m - 1) // m) * m


def _vmem_capacity_bytes():
    """Physical VMEM per TensorCore (falls back to v7x's 64 MiB if unknown)."""
    try:
        info = pltpu.get_tpu_info()
        cap = int(getattr(info, "vmem_capacity_bytes", 0) or 0)
        if cap > 0:
            return cap
    except Exception:
        pass
    return 64 << 20


def _per_pixel_vmem_bytes(c, itemsize):
    # Per pixel column, per block: double-buffered logits (2*C*itemsize),
    # ~4 (C,T)-sized f32 live temporaries inside the kernel, plus the
    # target / loss blocks and (1,T) f32 temps (~32 B).
    return 2 * c * itemsize + 4 * c * 4 + 32


def _choose_tile(hw, c, itemsize, budget, n):
    """Pixel-tile (lane count) per block, derived from a per-chip VMEM budget."""
    tile = int(budget // _per_pixel_vmem_bytes(c, itemsize))
    tile = max(1024, min(tile, 16384))      # >=1024 lanes keeps DMAs near roofline
    tile -= tile % 1024
    # Best effort: keep >= ~8 grid blocks so both v7x TensorCores get work
    # (a no-op on single-TC v5e/v6e).
    if n * _cdiv(hw, tile) < 8:
        tile = max(128, _round_up(_cdiv(hw, _cdiv(8, max(n, 1))), 128))
    if tile >= hw:
        return hw                           # single block: block dim == array dim
    return _round_up(tile, 128)             # tiled: lane dim must be 128-aligned


# ---------------------------------------------------------------------------
# Wrapper
# ---------------------------------------------------------------------------
@jax.jit
def per_pixel_cross_entropy(logits_nchw, target_nhw):
    """Returns (flat per-pixel CE losses (N*H*W,) f32, mean over all pixels)."""
    N, C, H, W = logits_nchw.shape
    HW = H * W
    itemsize = jnp.dtype(logits_nchw.dtype).itemsize

    cap = _vmem_capacity_bytes()
    budget = min(int(cap * 0.5), 72 << 20)          # per-generation tiling budget
    tile = _choose_tile(HW, C, itemsize, budget, N)
    num_pb = _cdiv(HW, tile)

    # Free reshapes only (no transpose, no pad): classes stay on the sublane
    # axis, pixels on the lane axis.
    logits = logits_nchw.reshape(N, C, HW)
    target = target_nhw.reshape(N, 1, HW).astype(jnp.int32)

    per_pixel = _per_pixel_vmem_bytes(C, itemsize)
    vmem_need = tile * per_pixel + (8 << 20)

    # Large-C regime: the budget forces a small pixel tile; deepen the logits
    # pipeline so per-step DMA latency stays hidden.
    logits_spec_kwargs = {}
    if budget // per_pixel < 4096:
        logits_spec_kwargs["pipeline_mode"] = pl.Buffered(3)
        vmem_need += C * tile * itemsize

    vmem_limit = int(min(max(vmem_need, 32 << 20), int(cap * 0.9)))

    kernel = functools.partial(_ce_kernel, hw=HW, tile=tile)

    losses, psums = pl.pallas_call(
        kernel,
        out_shape=(
            jax.ShapeDtypeStruct((N, 1, HW), jnp.float32),
            jax.ShapeDtypeStruct((N, num_pb, 1, 1), jnp.float32),
        ),
        grid_spec=pltpu.PrefetchScalarGridSpec(
            num_scalar_prefetch=0,
            grid=(N, num_pb),
            in_specs=[
                pl.BlockSpec((None, C, tile), lambda n, p: (n, 0, p),
                             **logits_spec_kwargs),
                pl.BlockSpec((None, 1, tile), lambda n, p: (n, 0, p)),
            ],
            out_specs=(
                # lane-dense per-pixel losses
                pl.BlockSpec((None, 1, tile), lambda n, p: (n, 0, p)),
                # tiny per-tile masked partial sums (warm-phase mean)
                pl.BlockSpec((None, None, 1, 1), lambda n, p: (n, p, 0, 0)),
            ),
        ),
        compiler_params=pltpu.CompilerParams(
            dimension_semantics=("parallel", "parallel"),
            vmem_limit_bytes=vmem_limit,
        ),
    )(logits, target)

    mean = jnp.sum(psums) / (N * HW)
    return losses.reshape(-1), mean


@jax.jit
def _topk_mean(raw_loss, k):
    """Exact mean of the k largest entries, with k a *traced* scalar.

    A full descending sort is the same cost class as lax.top_k (which also
    sorts on TPU), but the dynamic-k masked mean means k can change every
    iteration of the warm ramp without retriggering an XLA compile.
    """
    # TODO(synk): a 256-bin loss histogram (another tiny kernel output) plus a
    # threshold masked mean would remove the full sort entirely for megapixel
    # inputs; kept exact here to match torch.topk semantics.
    srt = jnp.sort(raw_loss)                        # ascending
    n = srt.shape[0]
    idx = jnp.arange(n, dtype=jnp.int32)
    keep = idx >= (n - k)                           # the k largest
    return jnp.sum(jnp.where(keep, srt, 0.0)) / k.astype(srt.dtype)


class BootstrappedCE:
    """JAX/Pallas port of the PyTorch BootstrappedCE module."""

    def __init__(self, start_warm, end_warm, top_p=0.15):
        self.start_warm = start_warm if start_warm is not None else float("inf")
        self.end_warm = end_warm
        self.top_p = top_p

    def __call__(self, input_nchw, target_nhw, it):
        # `it` is a host-side Python scalar, mirroring the PyTorch module's
        # Python control flow on the iteration counter.
        raw_loss, mean_loss = per_pixel_cross_entropy(input_nchw, target_nhw)

        if it < self.start_warm:
            # Warm phase: plain mean CE from the fused per-tile sums
            # (no extra HBM pass over raw_loss).
            return mean_loss, 1.0

        num_pixels = raw_loss.shape[0]
        if it > self.end_warm:
            this_p = self.top_p
        else:
            this_p = self.top_p + (1 - self.top_p) * (
                (self.end_warm - it) / (self.end_warm - self.start_warm))

        k = max(int(num_pixels * this_p), 1)        # guard against k == 0
        return _topk_mean(raw_loss, jnp.asarray(k, jnp.int32)), this_p


# ---------------------------------------------------------------------------
# Pure-JAX reference (for correctness checking only)
# ---------------------------------------------------------------------------
def _reference_per_pixel_ce(logits_nchw, target_nhw):
    N, C, H, W = logits_nchw.shape
    logits = jnp.transpose(logits_nchw, (0, 2, 3, 1)).reshape(-1, C)
    tgt = target_nhw.reshape(-1).astype(jnp.int32)
    logp = jax.nn.log_softmax(logits.astype(jnp.float32), axis=-1)
    return -jnp.take_along_axis(logp, tgt[:, None], axis=-1)[:, 0]


if __name__ == "__main__":
    key = jax.random.PRNGKey(0)
    k1, k2 = jax.random.split(key)

    N, C, H, W = 2, 4, 16, 16
    logits = jax.random.normal(k1, (N, C, H, W), dtype=jnp.float32)
    target = jax.random.randint(k2, (N, H, W), 0, C, dtype=jnp.int32)

    # Pallas hot path vs pure-JAX reference (losses + fused mean).
    kernel_losses, kernel_mean = per_pixel_cross_entropy(logits, target)
    kernel_losses = jax.block_until_ready(kernel_losses)
    kernel_mean = jax.block_until_ready(kernel_mean)
    ref_losses = jax.block_until_ready(_reference_per_pixel_ce(logits, target))
    assert jnp.allclose(kernel_losses, ref_losses, atol=1e-5, rtol=1e-5)
    assert jnp.allclose(kernel_mean, jnp.mean(ref_losses), atol=1e-5, rtol=1e-5)

    # Tail-block path: HW not a multiple of the tile (nor of 128).
    H2, W2 = 16, 10
    logits2 = jax.random.normal(k1, (N, C, H2, W2), dtype=jnp.float32)
    target2 = jax.random.randint(k2, (N, H2, W2), 0, C, dtype=jnp.int32)
    l2, m2 = per_pixel_cross_entropy(logits2, target2)
    ref2 = _reference_per_pixel_ce(logits2, target2)
    assert jnp.allclose(jax.block_until_ready(l2), ref2, atol=1e-5, rtol=1e-5)
    assert jnp.allclose(jax.block_until_ready(m2), jnp.mean(ref2),
                        atol=1e-5, rtol=1e-5)

    bce = BootstrappedCE(start_warm=1000, end_warm=2000, top_p=0.15)

    # Warm phase: plain mean CE.
    loss_warm, p_warm = bce(logits, target, it=10)
    loss_warm = jax.block_until_ready(loss_warm)
    assert p_warm == 1.0
    assert jnp.allclose(loss_warm, jnp.mean(ref_losses), atol=1e-5, rtol=1e-5)

    # Bootstrapped phase (inside the warm-up ramp).
    loss_mid, p_mid = bce(logits, target, it=1500)
    loss_mid = jax.block_until_ready(loss_mid)
    k_mid = int(ref_losses.shape[0] * p_mid)
    ref_mid = jnp.mean(jax.lax.top_k(ref_losses, k_mid)[0])
    assert jnp.allclose(loss_mid, ref_mid, atol=1e-5, rtol=1e-5)

    # Fully bootstrapped phase.
    loss_late, p_late = bce(logits, target, it=5000)
    loss_late = jax.block_until_ready(loss_late)
    assert p_late == 0.15
    k_late = max(int(ref_losses.shape[0] * 0.15), 1)
    ref_late = jnp.mean(jax.lax.top_k(ref_losses, k_late)[0])
    assert jnp.allclose(loss_late, ref_late, atol=1e-5, rtol=1e-5)

    print("KERNEL_OK")
</pallas_src>

<mosaic_0001>
module attributes {stable_mosaic.version = 11 : i64} {
  func.func @_ce_kernel(%arg0: i32, %arg1: i32, %arg2: memref<1x4x128xf32, #tpu.memory_space<vmem>>, %arg3: memref<1x1x128xi32, #tpu.memory_space<vmem>>, %arg4: memref<1x1x128xf32, #tpu.memory_space<vmem>>, %arg5: memref<1x1x1x1xf32, #tpu.memory_space<vmem>>) attributes {dimension_semantics = [#tpu.dimension_semantics<parallel>, #tpu.dimension_semantics<parallel>], iteration_bounds = array<i64: 2, 2>, scalar_prefetch = 0 : i64, scratch_operands = 0 : i64, tpu.core_type = #tpu.core_type<tc>, window_params = [{transform_indices = @transform_0, window_bounds = array<i64: 1, 4, 128>}, {transform_indices = @transform_1, window_bounds = array<i64: 1, 1, 128>}, {transform_indices = @transform_2, window_bounds = array<i64: 1, 1, 128>}, {transform_indices = @transform_3, window_bounds = array<i64: 1, 1, 1, 1>}]} {
    %c0 = arith.constant 0 : index
    %c0_0 = arith.constant 0 : index
    %c0_1 = arith.constant 0 : index
    %0 = vector.load %arg2[%c0, %c0_0, %c0_1] : memref<1x4x128xf32, #tpu.memory_space<vmem>>, vector<1x4x128xf32>
    %1 = vector.shape_cast %0 : vector<1x4x128xf32> to vector<4x128xf32>
    %c0_2 = arith.constant 0 : index
    %c0_3 = arith.constant 0 : index
    %c0_4 = arith.constant 0 : index
    %2 = vector.load %arg3[%c0_2, %c0_3, %c0_4] : memref<1x1x128xi32, #tpu.memory_space<vmem>>, vector<1x1x128xi32>
    %3 = vector.shape_cast %2 : vector<1x1x128xi32> to vector<1x128xi32>
    %cst = arith.constant dense<0xFF800000> : vector<128xf32>
    %4 = vector.multi_reduction <maximumf>, %1, %cst [0] : vector<4x128xf32> to vector<128xf32>
    %5 = vector.shape_cast %4 : vector<128xf32> to vector<1x128xf32>
    %6 = tpu.iota {dimensions = array<i32: 0>} : vector<4x128xi32>
    %7 = vector.broadcast %3 : vector<1x128xi32> to vector<4x128xi32>
    %8 = arith.cmpi eq, %6, %7 : vector<4x128xi32>
    %cst_5 = arith.constant 0.000000e+00 : f32
    %9 = vector.broadcast %cst_5 : f32 to vector<4x128xf32>
    %10 = arith.select %8, %1, %9 : vector<4x128xi1>, vector<4x128xf32>
    %cst_6 = arith.constant dense<0.000000e+00> : vector<128xf32>
    %11 = vector.multi_reduction <add>, %10, %cst_6 [0] : vector<4x128xf32> to vector<128xf32>
    %12 = vector.shape_cast %11 : vector<128xf32> to vector<1x128xf32>
    %13 = vector.broadcast %5 : vector<1x128xf32> to vector<4x128xf32>
    %14 = arith.subf %1, %13 : vector<4x128xf32>
    %15 = math.exp %14 : vector<4x128xf32>
    %cst_7 = arith.constant dense<0.000000e+00> : vector<128xf32>
    %16 = vector.multi_reduction <add>, %15, %cst_7 [0] : vector<4x128xf32> to vector<128xf32>
    %17 = vector.shape_cast %16 : vector<128xf32> to vector<1x128xf32>
    %18 = math.log %17 : vector<1x128xf32>
    %19 = arith.subf %5, %12 : vector<1x128xf32>
    %20 = arith.addf %18, %19 : vector<1x128xf32>
    %c0_8 = arith.constant 0 : index
    %c0_9 = arith.constant 0 : index
    %c0_10 = arith.constant 0 : index
    %21 = vector.load %arg4[%c0_8, %c0_9, %c0_10] : memref<1x1x128xf32, #tpu.memory_space<vmem>>, vector<1x1x128xf32>
    %22 = vector.shape_cast %21 : vector<1x1x128xf32> to vector<1x128xf32>
    %23 = vector.shape_cast %20 : vector<1x128xf32> to vector<1x1x128xf32>
    tpu.vector_store %arg4[%c0_8, %c0_9, %c0_10], %23 {strides = array<i32>} : memref<1x1x128xf32, #tpu.memory_space<vmem>>, vector<1x1x128xf32>,
    %24 = tpu.iota {dimensions = array<i32: 1>} : vector<1x128xi32>
    %c128_i32 = arith.constant 128 : i32
    %25 = arith.muli %arg1, %c128_i32 : i32
    %26 = vector.broadcast %25 : i32 to vector<1x128xi32>
    %27 = arith.addi %26, %24 : vector<1x128xi32>
    %c256_i32 = arith.constant 256 : i32
    %28 = vector.broadcast %c256_i32 : i32 to vector<1x128xi32>
    %29 = arith.cmpi slt, %27, %28 : vector<1x128xi32>
    %cst_11 = arith.constant 0.000000e+00 : f32
    %30 = vector.broadcast %cst_11 : f32 to vector<1x128xf32>
    %31 = arith.select %29, %20, %30 : vector<1x128xi1>, vector<1x128xf32>
    %cst_12 = arith.constant dense<0.000000e+00> : vector<1xf32>
    %32 = vector.multi_reduction <add>, %31, %cst_12 [1] : vector<1x128xf32> to vector<1xf32>
    %33 = vector.shape_cast %32 : vector<1xf32> to vector<1x1xf32>
    %c0_13 = arith.constant 0 : index
    %c0_14 = arith.constant 0 : index
    %c0_15 = arith.constant 0 : index
    %c0_16 = arith.constant 0 : index
    %34 = vector.load %arg5[%c0_13, %c0_14, %c0_15, %c0_16] : memref<1x1x1x1xf32, #tpu.memory_space<vmem>>, vector<1x1x1x1xf32>
    %35 = vector.shape_cast %34 : vector<1x1x1x1xf32> to vector<1x1xf32>
    %36 = vector.shape_cast %33 : vector<1x1xf32> to vector<1x1x1x1xf32>
    tpu.vector_store %arg5[%c0_13, %c0_14, %c0_15, %c0_16], %36 {strides = array<i32>} : memref<1x1x1x1xf32, #tpu.memory_space<vmem>>, vector<1x1x1x1xf32>,
    return
  }
  func.func @transform_0(%arg0: i32, %arg1: i32) -> (i32, i32, i32) {
    %c0_i32 = arith.constant 0 : i32
    %c0_i32_0 = arith.constant 0 : i32
    return %arg0, %c0_i32, %arg1 : i32, i32, i32
  }
  func.func @transform_1(%arg0: i32, %arg1: i32) -> (i32, i32, i32) {
    %c0_i32 = arith.constant 0 : i32
    %c0_i32_0 = arith.constant 0 : i32
    return %arg0, %c0_i32, %arg1 : i32, i32, i32
  }
  func.func @transform_2(%arg0: i32, %arg1: i32) -> (i32, i32, i32) {
    %c0_i32 = arith.constant 0 : i32
    %c0_i32_0 = arith.constant 0 : i32
    return %arg0, %c0_i32, %arg1 : i32, i32, i32
  }
  func.func @transform_3(%arg0: i32, %arg1: i32) -> (i32, i32, i32, i32) {
    %c0_i32 = arith.constant 0 : i32
    %c0_i32_0 = arith.constant 0 : i32
    %c0_i32_1 = arith.constant 0 : i32
    return %arg0, %arg1, %c0_i32, %c0_i32_0 : i32, i32, i32, i32
  }
}

</mosaic_0001>

<bundles_post_ra>
// kernel: per_pixel_cross_entropy.1
= control target key start
LH: loop header
LB: loop body
LE: loop exit
PB: predicated region body
PF: predicated region fallthrough
CT: control target
= control target key end

     0   :  { %9 = vsyncpa [#allocation3], 0  ;;  %s780_s0 = inlined_call_operand.vmem [shape: f32[2,4,256], index: 0, kind: input, shape index: {}]   ;;  %s781_s1 = inlined_call_operand.vmem [shape: s32[2,1,256], index: 1, kind: input, shape index: {}]   ;;  %s782_s2 = inlined_call_operand.hbm [shape: f32[2,1,256], index: 2, kind: output, shape index: {0}]   ;;  %s783_s3 = inlined_call_operand.vmem [shape: f32[2,2,1,1], index: 3, kind: output, shape index: {1}]  }
   0x1   :  { %11 = vsyncpa [#allocation3 + $0x1], 0  ;;  %s641_s12 = smov 0   ;;  %s643_s13 = smov 0  }
   0x2   :  { %s645_s14 = smov 0   ;;  %s647_s15 = smov 0  }
   0x3   :  { %s649_s16 = smov 0   ;;  %s651_s17 = smov 0  }
   0x4   :  { %s653_s18 = smov 0   ;;  %s655_s19 = smov 0  }
   0x5 LB: > { %s436_s20 = sadd.s32 4294967295, %s618_s19   ;;  %s437_s21 = sadd.s32 4294967294, %s618_s19   ;;  %s618_s19 = sphi %s655_s19, %s17_s19   ;;  %s614_s18 = sphi %s653_s18, %s792_s18   ;;  %s610_s17 = sphi %s651_s17, %s791_s17   ;;  %s606_s16 = sphi %s649_s16, %s790_s16   ;;  %s602_s15 = sphi %s647_s15, %s789_s15   ;;  %s598_s14 = sphi %s645_s14, %s788_s14   ;;  %s594_s13 = sphi %s643_s13, %s787_s13   ;;  %s590_s12 = sphi %s641_s12, %s786_s12  }
   0x6   : > { %s26_s22 = sadd.s32 1, %s610_s17  ;;  %s29_s23 = sadd.s32 1, %s614_s18 }
   0x7   : > { %p27_p0 = scmp.ge.s32.totalorder %s26_s22, 2  ;;  %p104_p1 = scmp.ne.s32.totalorder %s598_s14, %s594_s13 }
   0x8   : > { %p105_p2 = scmp.eq.s32.totalorder %s436_s20, 3  ;;  %p110_p5 = scmp.ne.s32.totalorder %s594_s13, %s590_s12 }
   0x9   : > { %s794_s22 = smov (%p27_p0, %s26_s22), 0  ;;  %s796_s23 = smov (!%p27_p0, %s29_s23), %s614_s18 }
   0xa   : > { %s90_s24 = ssub.s32 %s610_s17, %s794_s22  ;;  %p692_p3 = por %p105_p2, %p104_p1 }
   0xb   : > { %p31_p4 = scmp.ge.s32.totalorder %s796_s23, 2  ;;  %p111_p6 = scmp.eq.s32.totalorder %s437_s21, 3 }
   0xc   : > { %p440_p7 = scmp.ge.s32.totalorder %s618_s19, 1  ;;  %p178_p9 = scmp.lt.s32.totalorder %s618_s19, 5 }
   0xd   : > { %s798_s23 = smov (%p31_p4, %s796_s23), 0  ;;  %p701_p8 = por %p111_p6, %p110_p5 }
   0xe   : > { %s89_s27 = ssub.s32 %s614_s18, %s798_s23  ;;  %s94_s28 = sadd.s32 1, %s598_s14 }
   0xf   : > { %s91_s29 = sor.u32 %s90_s24, %s89_s27  ;;  %p179_p10 = pnand %p440_p7, %p178_p9 }
  0x10   : > { %p92_p11 = scmp.eq.s32.totalorder %s91_s29, 0  ;;  %p218_p12 = scmp.lt.s32.totalorder (!%p179_p10), %s606_s16, 1 }
  0x11   : > { %182 = sbr.rel (%p179_p10) target bundleno = 231 (0xe7), region = 28  ;;  %p220_p13 = scmp.lt.s32.totalorder (!%p179_p10), %s602_s15, 1 }
  0x12   : > { %s710_s30 = scalar_select %p92_p11, %s598_s14, %s94_s28  }
  0x13   : > { %s446_s27 = sshll.u32 (!%p179_p10), %s602_s15, 7  ;;  %s207_s28 = sand.u32 (!%p179_p10), 1, %s594_s13  }
  0x14   : > { %s447_s29 = sshll.u32 (!%p179_p10), %s606_s16, 1  ;;  %s292_s20 = scalar_lea.sflag (!%p179_p10), [#allocation3], %s207_s28 }
  0x16   : > { %s219_s4 = scalar_select %p218_p12, %s606_s16, 1  ;;  %vm242_vm0 = vcmask 1043456   ;;  %v250_v9 = vlaneseq  ;;  %v283_v30 = vstv %s446_s27 }
  0x17   : > { %s221_s5 = scalar_select %p220_p13, %s602_s15, 1 }
  0x18   : > { %s441_s6 = sshll.u32 %s219_s4, 1  ;;  %v251_v11 = vshrl.u32 %v250_v9, 7  ;;  %v281_v28 = vand.u32 127, %v250_v9  ;;  %s309_s4 = sadd.s32 %s602_s15, %s447_s29 }
  0x19   : > { %s716_s7 = sadd.s32 %s441_s6, %s221_s5  ;;  %s208_s5 = scalar_lea.vmem [#allocation2], %s207_s28 }
  0x1a   : > { %s442_s8 = sshll.u32 %s716_s7, 2  ;;  %s232_s24 = scalar_lea.vmem %s781_s1, %s716_s7  ;;  %v284_v31 = vadd.s32 %v283_v30, %v281_v28 }
  0x1b   : > { %s225_s11 = scalar_lea.vmem %s780_s0, %s442_s8  ;;  %v445_v12 = vld [vmem:[%s232_s24] ss:$0 sm:$0xff]  ;;  %s448_s6 = sshll.u32 %s309_s4, 4 }
  0x1c   : > { %v240_v0 = vld [vmem:[%s225_s11] sm:$0xf]  ;;  %vm256_vm1 = vcmp.eq.s32.totalorder %v251_v11, %v445_v12  ;;  %vm285_vm2 = vcmp.lt.s32.totalorder %v284_v31, 256  ;;  %s313_s8 = sshll.u32 %s208_s5, 4  ;;  %s311_s11 = scalar_lea.hbm %s782_s2, %s448_s6  ;;  %s314_s8 = int_to_ptr.vmem [resolvable:$true] %s313_s8 }
  0x1d   : > { %v243_v1 = vsel %vm242_vm0, %v240_v0, -inf  ;;  %v257_v13 = vsel %vm256_vm1, %v240_v0, 0.0  ;;  %s526_s21 = scalar_lea.vmem %s314_s8, 16  ;;  %s620_s24 = smov [#allocation2]  }
  0x1e   : > { %v244_v2 = vrot.slane %v243_v1, 4  ;;  %v258_v14 = vsel %vm242_vm0, %v257_v13, 0.0  ;;  %p527_p0 = scmp.ne.s32.totalorder %s314_s8, %s526_s21  ;;  %s530_s27 = sshll.u32 %s620_s24, 4  ;;  %s531_s27 = int_to_ptr.vmem [resolvable:$false] %s530_s27 }
  0x1f   : > { %v259_v17 = vrot.slane %v258_v14, 4  ;;  %s532_s16 = scalar_lea.vmem %s531_s27, 32  ;;  %p533_p4 = scmp.lt.s32.totalorder %s314_s8, %s531_s27 }
  0x20   : > { %v245_v3 = vmax.f32 %v243_v1, %v244_v2  ;;  %p528_p1 = pnand %p527_p0, %p692_p3  ;;  %p534_p5 = scmp.lt.s32.totalorder %s532_s16, %s526_s21 }
  0x21   : > { %v260_v20 = vadd.f32 %v259_v17, %v258_v14 }
  0x22   : > { %v246_v4 = vrot.slane %v245_v3, 2  ;;  %p529_p2 = pneg %p528_p1  ;;  %p535_p6 = por %p534_p5, %p533_p4 }
  0x23   : > { %v261_v23 = vrot.slane %v260_v20, 2 }
  0x24   : > { %v247_v5 = vmax.f32 %v245_v3, %v246_v4  ;;  %p536_p7 = pnand %p535_p6, %p529_p2 }
  0x25   : > { %v262_v26 = vadd.f32 %v261_v23, %v260_v20 }
  0x26   : > { %v248_v6 = vrot.slane %v247_v5, 1 }
  0x27   : > { %v263_v27 = vrot.slane %v262_v26, 1 }
  0x28   : > { %v249_v7 = vmax.f32 %v247_v5, %v248_v6 }
  0x29   : > { %v264_v29 = vadd.f32 %v263_v27, %v262_v26 }
  0x2a   : > { %v265_v8 = vsub.f32 %v240_v0, %v249_v7 }
  0x2b   : > { %v277_v32 = vsub.f32 %v249_v7, %v264_v29 }
  0x2c   : > { %v266_v10 = vmul.f32 1.442695, %v265_v8 }
  0x2e   : > { %522 = vpow2.f32 %v266_v10 }
  0x3b   : > { %v523_v15 = vpop.eup %522 }
  0x3c   : > { %v268_v16 = vsel %vm242_vm0, %v523_v15, 0.0 }
  0x3d   : > { %v269_v18 = vrot.slane %v268_v16, 4 }
  0x3f   : > { %v270_v19 = vadd.f32 %v269_v18, %v268_v16 }
  0x41   : > { %v271_v21 = vrot.slane %v270_v19, 2 }
  0x43   : > { %v272_v22 = vadd.f32 %v271_v21, %v270_v19 }
  0x45   : > { %v273_v24 = vrot.slane %v272_v22, 1 }
  0x47   : > { %v274_v25 = vadd.f32 %v273_v24, %v272_v22 }
  0x49   : > { %524 = vlog2.f32 %v274_v25 }
  0x56   : > { %v525_v33 = vpop.eup %524 }
  0x57   : > { %v276_v34 = vmul.f32 0.6931472, %v525_v33 }
  0x59   : > { %v278_v35 = vadd.f32 %v277_v32, %v276_v34 }
  0x5b   : > { %v286_v36 = vsel %vm285_vm2, %v278_v35, 0.0  ;;  %279 = vst [vmem:[%s208_s5] sm:$0x1] %v278_v35 }
  0x5c   : > { %287 = vadd.xlane.f32.xlu0 %v286_v36 }
  0x5d   : > { %539 = shalt.err (!%p536_p7)
}
  0x5e   : > { %s540_s15 = scalar_lea.hbm %s311_s11, 16  ;;  %s544_s4 = scalar_lea.hbm %s782_s2, 64 }
  0x5f   : > { %p541_p9 = scmp.ne.s32.totalorder %s311_s11, %s540_s15  ;;  %p545_p12 = scmp.lt.s32.totalorder %s311_s11, %s782_s2 }
  0x60   : > { %p546_p13 = scmp.lt.s32.totalorder %s544_s4, %s540_s15 }
  0x61   : > { %p542_p10 = pnand %p541_p9, %p692_p3 }
  0x62   : > { %p547_p0 = por %p546_p13, %p545_p12 }
  0x63   : > { %p543_p11 = pneg %p542_p10 }
  0x65   : > { %p548_p1 = pnand %p547_p0, %p543_p11 }
  0x67   : > { %551 = shalt.err (!%p548_p1)
}
  0x68   : > { %451 = dma.vmem_to_hbm [thread:$0]  (%p692_p3), %s314_s8, 16, %s311_s11, %s292_s20   ;;  %vm289_vm3 = vcmask 0  }
  0x69   : > { %s239_s21 = scalar_lea.vmem %s783_s3, %s716_s7 }
  0xe5   : > { %v288_v37 = vpop.xlane.xlu0 %287 }
  0xe6   : > { %290 = vst.msk [vmem:[%s239_s21] sm:$0x1] %vm289_vm3, %v288_v37 }
  0xe7 PF: > { %p457_p2 = scmp.ge.s32.totalorder %s618_s19, 2  ;;  %s328_s24 = sand.u32 1, %s590_s12  }
  0xe8   : > { %s329_s27 = scalar_lea.sflag [#allocation3], %s328_s24 }
  0xe9   : > { %p454_p4 = pnand %p457_p2, %p701_p8 }
  0xeb   : > { %p455_p5 = pneg %p454_p4 }
  0xed   : > { %585 = dma.done.wait (%p455_p5), %s329_s27, 16  }
  0xee   : > { %587 = vsyncadd (%p455_p5), %s329_s27, 4294967280  ;;  %s17_s19 = sadd.s32 1, %s618_s19   ;;  %s786_s12 = smov %s594_s13 }
  0xef   : > { %p14_p3 = scmp.ge.s32.totalorder %s17_s19, 6   ;;  %s787_s13 = smov %s598_s14 }
  0xf0   : > { %s788_s14 = smov %s710_s30  ;;  %s789_s15 = smov %s610_s17 }
  0xf1   : > { %s790_s16 = smov %s614_s18  ;;  %s791_s17 = smov %s794_s22 }
  0xf2   : > { %s792_s18 = smov %s798_s23  ;;  %16 = sbr.rel (!%p14_p3) target bundleno = 5 (0x5), region = 78 }
  0xf7   :  { %343 = vsyncpa [#allocation3], 1 }
  0xf8   :  { %345 = vsyncpa [#allocation3 + $0x1], 1 }

</bundles_post_ra>
